<compile_context>
chip_gen: v7x
topology: tpu7x:2x2x1
jax: 0.10.0
libtpu: 0.0.40
codegen_flags: <defaults>
</compile_context>

<pallas_src>
import math
from functools import partial

import jax
import jax.numpy as jnp
from jax import lax
from jax.experimental import pallas as pl
from jax.experimental.pallas import tpu as pltpu


def decoder_layer_kernel(
    q_ref, k_ref,
    wq_ref, bq_ref, wkv_ref, bkv_ref,
    wo_ref, bo_ref,
    w1_ref, b1_ref, w2_ref, b2_ref,
    g1_ref, be1_ref, g2_ref, be2_ref,
    out_ref,
    ctx_ref,
    *, n_heads: int, block_b: int,
):
    f32 = jnp.float32
    bf16 = jnp.bfloat16
    H = n_heads
    Mq, D = q_ref.shape            # Mq = block_b * L
    Mk = k_ref.shape[0]            # Mk = block_b * S
    L = Mq // block_b
    S = Mk // block_b
    dk = D // H

    def layer_norm(v, g, b):
        # One-pass statistics: single lane-axis pass for sum and sum-of-squares.
        inv_d = 1.0 / D
        mu = jnp.sum(v, axis=-1, keepdims=True) * inv_d
        ms = jnp.sum(v * v, axis=-1, keepdims=True) * inv_d
        var = ms - mu * mu
        return (v - mu) * lax.rsqrt(var + 1e-5) * g + b

    # ---- lane-dense projections (scale folded into Wq/bq; K,V fused) --------
    qb = q_ref[...].astype(bf16)                                   # (Mq, D)
    kb = k_ref[...].astype(bf16)                                   # (Mk, D)
    Q = jnp.dot(qb, wq_ref[...], preferred_element_type=f32) + bq_ref[...]     # (Mq, D)
    KV = jnp.dot(kb, wkv_ref[...], preferred_element_type=f32) + bkv_ref[...]  # (Mk, 2D)

    Qb = Q.astype(bf16)
    Kb = KV[:, :D].astype(bf16)
    Vb = KV[:, D:].astype(bf16)

    # ---- attention: heads split only here; ctx written into VMEM scratch ----
    # TODO(synk): attention dropout omitted (inference-mode identity).
    for b in range(block_b):       # block_b is small/static; per-iter temps die
        for h in range(H):         # at the ctx_ref store (no big live set)
            qh = Qb[b * L:(b + 1) * L, h * dk:(h + 1) * dk]        # (L, dk)
            kh = Kb[b * S:(b + 1) * S, h * dk:(h + 1) * dk]        # (S, dk)
            vh = Vb[b * S:(b + 1) * S, h * dk:(h + 1) * dk]        # (S, dk)

            s = jnp.einsum("qd,kd->qk", qh, kh,
                           preferred_element_type=f32)             # (L, S)
            s = s - jnp.max(s, axis=-1, keepdims=True)
            p = jnp.exp(s)
            p = p * pl.reciprocal(jnp.sum(p, axis=-1, keepdims=True), approx=True)

            ctx_h = jnp.dot(p.astype(bf16), vh,
                            preferred_element_type=f32)            # (L, dk)
            ctx_ref[b * L:(b + 1) * L, h * dk:(h + 1) * dk] = ctx_h.astype(bf16)

    # ---- single lane-dense output projection (heads contracted on the MXU) --
    new_q = jnp.dot(ctx_ref[...], wo_ref[...],
                    preferred_element_type=f32) + bo_ref[...]      # (Mq, D)

    # ---- residual + norm1 (q re-read here instead of held across attention) -
    x = q_ref[...] + new_q
    y = layer_norm(x, g1_ref[...], be1_ref[...])

    # ---- position-wise FFN (Conv1d k=1 == per-position Linear), ReLU --------
    h1 = jnp.maximum(
        jnp.dot(y.astype(bf16), w1_ref[...], preferred_element_type=f32) + b1_ref[...],
        0.0).astype(bf16)                                          # fused bias+relu+cast
    y2 = jnp.dot(h1, w2_ref[...], preferred_element_type=f32) + b2_ref[...]

    # ---- residual + norm2 ----------------------------------------------------
    out_ref[...] = layer_norm(x + y2, g2_ref[...], be2_ref[...])


def _vmem_limit_bytes():
    cap = None
    try:
        cap = int(pltpu.get_tpu_info().vmem_capacity_bytes)
    except Exception:
        cap = None
    if cap is None:
        return 48 * 1024 * 1024          # conservative: safe on v7x (64 MiB/TC)
    return min(64 * 1024 * 1024, (cap * 3) // 4)


def _auto_block_b(B, L, S, *, min_steps=4, max_rows=512):
    """Largest divisor of B keeping >= min_steps grid steps and legal tiling."""
    def tiling_ok(cand):
        if B % cand:
            return False
        rq, rk = cand * L, cand * S
        if rq % 8 and cand != B:
            return False
        if rk % 8 and cand != B:
            return False
        return True

    best = None
    for cand in range(1, B + 1):
        if not tiling_ok(cand):
            continue
        if cand > 1 and B // cand < min_steps:
            continue
        if cand > 1 and cand * max(L, S) > max_rows:
            continue
        best = cand
    if best is None:
        best = B                         # single step over the full batch
    return best


def _const_spec(arr):
    """Full-array, grid-invariant weight spec; single-buffered when supported."""
    nd = arr.ndim
    idx = lambda b, nd=nd: (0,) * nd
    try:
        return pl.BlockSpec(arr.shape, idx, pipeline_mode=pl.Buffered(1))
    except TypeError:                    # older jax without pipeline_mode kwarg
        return pl.BlockSpec(arr.shape, idx)


def decoder_layer(q, k, params, n_heads, *, block_b=None):
    """q: (B, L, D) float32, k: (B, S, D) float32 -> (B, L, D) float32."""
    B, L, D = q.shape
    _, S, _ = k.shape
    H = n_heads
    assert D % H == 0, "d_model must be divisible by n_heads"
    dk = D // H
    if block_b is None:
        block_b = _auto_block_b(B, L, S)
    assert B % block_b == 0, "block_b must divide batch"
    Mq, Mk = block_b * L, block_b * S
    assert Mq % 8 == 0 or Mq == B * L, "block rows (block_b*L) must be a multiple of 8"
    assert Mk % 8 == 0 or Mk == B * S, "block rows (block_b*S) must be a multiple of 8"

    scale = 1.0 / math.sqrt(dk)
    bf16, f32 = jnp.bfloat16, jnp.float32

    # ---- wrapper-side weight prep: scale folding, K/V fusion, bf16 cast -----
    wq = (params["wq"] * scale).astype(bf16)                               # (D, D)
    bq = (params["bq"] * scale).astype(f32)                                # (1, D)
    wkv = jnp.concatenate([params["wk"], params["wv"]], axis=1).astype(bf16)  # (D, 2D)
    bkv = jnp.concatenate([params["bk"], params["bv"]], axis=1).astype(f32)   # (1, 2D)
    wo = params["wo"].astype(bf16)                                          # (D, D)
    bo = params["bo"].astype(f32)
    w1 = params["w1"].astype(bf16)
    b1 = params["b1"].astype(f32)
    w2 = params["w2"].astype(bf16)
    b2 = params["b2"].astype(f32)
    g1, be1 = params["g1"].astype(f32), params["be1"].astype(f32)
    g2, be2 = params["g2"].astype(f32), params["be2"].astype(f32)

    weights = (wq, bq, wkv, bkv, wo, bo, w1, b1, w2, b2, g1, be1, g2, be2)

    # Flatten activations so the kernel sees clean 2-D row slabs.
    q_flat = q.reshape(B * L, D)
    k_flat = k.reshape(B * S, D)

    in_specs = [
        pl.BlockSpec((Mq, D), lambda b: (b, 0)),       # q rows (double-buffered)
        pl.BlockSpec((Mk, D), lambda b: (b, 0)),       # k rows (double-buffered)
    ] + [_const_spec(a) for a in weights]

    out = pl.pallas_call(
        partial(decoder_layer_kernel, n_heads=H, block_b=block_b),
        out_shape=jax.ShapeDtypeStruct((B * L, D), jnp.float32),
        grid=(B // block_b,),
        in_specs=in_specs,
        out_specs=pl.BlockSpec((Mq, D), lambda b: (b, 0)),
        scratch_shapes=[pltpu.VMEM((Mq, D), jnp.bfloat16)],   # per-head ctx slab
        compiler_params=pltpu.CompilerParams(
            dimension_semantics=("parallel",),
            vmem_limit_bytes=_vmem_limit_bytes(),
        ),
    )(q_flat, k_flat, *weights)
    return out.reshape(B, L, D)


def reference_decoder_layer(q, k, params, n_heads):
    """Pure-JAX f32 reference matching the PyTorch forward (eval mode)."""
    B, L, D = q.shape
    _, S, _ = k.shape
    dk = D // n_heads
    Q = q @ params["wq"] + params["bq"][0]
    K = k @ params["wk"] + params["bk"][0]
    V = k @ params["wv"] + params["bv"][0]
    Q = Q.reshape(B, L, n_heads, dk)
    K = K.reshape(B, S, n_heads, dk)
    V = V.reshape(B, S, n_heads, dk)
    scores = jnp.einsum("blhd,bshd->bhls", Q, K)
    A = jax.nn.softmax(scores / math.sqrt(dk), axis=-1)
    ctx = jnp.einsum("bhls,bshd->blhd", A, V).reshape(B, L, D)
    new_q = ctx @ params["wo"] + params["bo"][0]
    x = q + new_q

    def ln(v, g, b):
        mu = jnp.mean(v, -1, keepdims=True)
        var = jnp.mean((v - mu) ** 2, -1, keepdims=True)
        return (v - mu) / jnp.sqrt(var + 1e-5) * g[0] + b[0]

    y = ln(x, params["g1"], params["be1"])
    y = jnp.maximum(y @ params["w1"] + params["b1"][0], 0.0)
    y = y @ params["w2"] + params["b2"][0]
    return ln(x + y, params["g2"], params["be2"])


def init_params(key, d_model, d_ff):
    ks = jax.random.split(key, 8)
    sc = 0.05
    return {
        "wq": sc * jax.random.normal(ks[0], (d_model, d_model), jnp.float32),
        "wk": sc * jax.random.normal(ks[1], (d_model, d_model), jnp.float32),
        "wv": sc * jax.random.normal(ks[2], (d_model, d_model), jnp.float32),
        "wo": sc * jax.random.normal(ks[3], (d_model, d_model), jnp.float32),
        "w1": sc * jax.random.normal(ks[4], (d_model, d_ff), jnp.float32),
        "w2": sc * jax.random.normal(ks[5], (d_ff, d_model), jnp.float32),
        "bq": 0.01 * jax.random.normal(ks[6], (1, d_model), jnp.float32),
        "bk": jnp.zeros((1, d_model), jnp.float32),
        "bv": jnp.zeros((1, d_model), jnp.float32),
        "bo": jnp.zeros((1, d_model), jnp.float32),
        "b1": 0.01 * jax.random.normal(ks[7], (1, d_ff), jnp.float32),
        "b2": jnp.zeros((1, d_model), jnp.float32),
        "g1": jnp.ones((1, d_model), jnp.float32),
        "be1": jnp.zeros((1, d_model), jnp.float32),
        "g2": jnp.ones((1, d_model), jnp.float32),
        "be2": jnp.zeros((1, d_model), jnp.float32),
    }


if __name__ == "__main__":
    B, L, S = 4, 8, 8
    d_model, n_heads = 32, 4
    d_ff = 4 * d_model

    key = jax.random.PRNGKey(0)
    kq, kk, kp = jax.random.split(key, 3)
    q = jax.random.normal(kq, (B, L, d_model), jnp.float32)
    k = jax.random.normal(kk, (B, S, d_model), jnp.float32)
    params = init_params(kp, d_model, d_ff)

    out = decoder_layer(q, k, params, n_heads)      # auto block_b -> 4 grid steps
    out = jax.block_until_ready(out)

    ref = reference_decoder_layer(q, k, params, n_heads)
    assert out.shape == (B, L, d_model)
    # bf16 matmuls + approx reciprocal -> loosened tolerance vs f32 reference.
    err = float(jnp.max(jnp.abs(out - ref)))
    assert jnp.allclose(out, ref, atol=3e-2, rtol=3e-2), (
        f"mismatch vs reference (max err {err})")

    print("KERNEL_OK")
</pallas_src>

<mosaic_0001>
module attributes {stable_mosaic.version = 11 : i64} {
  func.func @decoder_layer_kernel(%arg0: i32, %arg1: memref<8x32xf32, #tpu.memory_space<vmem>>, %arg2: memref<8x32xf32, #tpu.memory_space<vmem>>, %arg3: memref<32x32xbf16, #tpu.memory_space<vmem>>, %arg4: memref<1x32xf32, #tpu.memory_space<vmem>>, %arg5: memref<32x64xbf16, #tpu.memory_space<vmem>>, %arg6: memref<1x64xf32, #tpu.memory_space<vmem>>, %arg7: memref<32x32xbf16, #tpu.memory_space<vmem>>, %arg8: memref<1x32xf32, #tpu.memory_space<vmem>>, %arg9: memref<32x128xbf16, #tpu.memory_space<vmem>>, %arg10: memref<1x128xf32, #tpu.memory_space<vmem>>, %arg11: memref<128x32xbf16, #tpu.memory_space<vmem>>, %arg12: memref<1x32xf32, #tpu.memory_space<vmem>>, %arg13: memref<1x32xf32, #tpu.memory_space<vmem>>, %arg14: memref<1x32xf32, #tpu.memory_space<vmem>>, %arg15: memref<1x32xf32, #tpu.memory_space<vmem>>, %arg16: memref<1x32xf32, #tpu.memory_space<vmem>>, %arg17: memref<8x32xf32, #tpu.memory_space<vmem>>, %arg18: memref<8x32xbf16, #tpu.memory_space<vmem>>) attributes {dimension_semantics = [#tpu.dimension_semantics<parallel>], iteration_bounds = array<i64: 4>, scalar_prefetch = 0 : i64, scratch_operands = 1 : i64, tpu.core_type = #tpu.core_type<tc>, window_params = [{transform_indices = @transform_0, window_bounds = array<i64: 8, 32>}, {transform_indices = @transform_1, window_bounds = array<i64: 8, 32>}, {pipeline_mode = #tpu.pipeline_mode<synchronous>, transform_indices = @transform_2, window_bounds = array<i64: 32, 32>}, {pipeline_mode = #tpu.pipeline_mode<synchronous>, transform_indices = @transform_3, window_bounds = array<i64: 1, 32>}, {pipeline_mode = #tpu.pipeline_mode<synchronous>, transform_indices = @transform_4, window_bounds = array<i64: 32, 64>}, {pipeline_mode = #tpu.pipeline_mode<synchronous>, transform_indices = @transform_5, window_bounds = array<i64: 1, 64>}, {pipeline_mode = #tpu.pipeline_mode<synchronous>, transform_indices = @transform_6, window_bounds = array<i64: 32, 32>}, {pipeline_mode = #tpu.pipeline_mode<synchronous>, transform_indices = @transform_7, window_bounds = array<i64: 1, 32>}, {pipeline_mode = #tpu.pipeline_mode<synchronous>, transform_indices = @transform_8, window_bounds = array<i64: 32, 128>}, {pipeline_mode = #tpu.pipeline_mode<synchronous>, transform_indices = @transform_9, window_bounds = array<i64: 1, 128>}, {pipeline_mode = #tpu.pipeline_mode<synchronous>, transform_indices = @transform_10, window_bounds = array<i64: 128, 32>}, {pipeline_mode = #tpu.pipeline_mode<synchronous>, transform_indices = @transform_11, window_bounds = array<i64: 1, 32>}, {pipeline_mode = #tpu.pipeline_mode<synchronous>, transform_indices = @transform_12, window_bounds = array<i64: 1, 32>}, {pipeline_mode = #tpu.pipeline_mode<synchronous>, transform_indices = @transform_13, window_bounds = array<i64: 1, 32>}, {pipeline_mode = #tpu.pipeline_mode<synchronous>, transform_indices = @transform_14, window_bounds = array<i64: 1, 32>}, {pipeline_mode = #tpu.pipeline_mode<synchronous>, transform_indices = @transform_15, window_bounds = array<i64: 1, 32>}, {transform_indices = @transform_16, window_bounds = array<i64: 8, 32>}]} {
    %c0 = arith.constant 0 : index
    %c0_0 = arith.constant 0 : index
    %0 = vector.load %arg1[%c0, %c0_0] : memref<8x32xf32, #tpu.memory_space<vmem>>, vector<8x32xf32>
    %1 = arith.truncf %0 : vector<8x32xf32> to vector<8x32xbf16>
    %c0_1 = arith.constant 0 : index
    %c0_2 = arith.constant 0 : index
    %2 = vector.load %arg2[%c0_1, %c0_2] : memref<8x32xf32, #tpu.memory_space<vmem>>, vector<8x32xf32>
    %3 = arith.truncf %2 : vector<8x32xf32> to vector<8x32xbf16>
    %c0_3 = arith.constant 0 : index
    %c0_4 = arith.constant 0 : index
    %4 = vector.load %arg3[%c0_3, %c0_4] : memref<32x32xbf16, #tpu.memory_space<vmem>>, vector<32x32xbf16>
    %cst = arith.constant dense<0.000000e+00> : vector<8x32xf32>
    %5 = tpu.matmul %1, %4, %cst {dimension_numbers = #tpu.dot_dimension_numbers<[1], [0], [0], [1], [0, 0, 1, 1], [], []>} : vector<8x32xbf16>, vector<32x32xbf16>, vector<8x32xf32> -> vector<8x32xf32>
    %c0_5 = arith.constant 0 : index
    %c0_6 = arith.constant 0 : index
    %6 = vector.load %arg4[%c0_5, %c0_6] : memref<1x32xf32, #tpu.memory_space<vmem>>, vector<1x32xf32>
    %7 = vector.broadcast %6 : vector<1x32xf32> to vector<8x32xf32>
    %8 = arith.addf %5, %7 : vector<8x32xf32>
    %c0_7 = arith.constant 0 : index
    %c0_8 = arith.constant 0 : index
    %9 = vector.load %arg5[%c0_7, %c0_8] : memref<32x64xbf16, #tpu.memory_space<vmem>>, vector<32x64xbf16>
    %cst_9 = arith.constant dense<0.000000e+00> : vector<8x64xf32>
    %10 = tpu.matmul %3, %9, %cst_9 {dimension_numbers = #tpu.dot_dimension_numbers<[1], [0], [0], [1], [0, 0, 1, 1], [], []>} : vector<8x32xbf16>, vector<32x64xbf16>, vector<8x64xf32> -> vector<8x64xf32>
    %c0_10 = arith.constant 0 : index
    %c0_11 = arith.constant 0 : index
    %11 = vector.load %arg6[%c0_10, %c0_11] : memref<1x64xf32, #tpu.memory_space<vmem>>, vector<1x64xf32>
    %12 = vector.broadcast %11 : vector<1x64xf32> to vector<8x64xf32>
    %13 = arith.addf %10, %12 : vector<8x64xf32>
    %14 = arith.truncf %8 : vector<8x32xf32> to vector<8x32xbf16>
    %15 = vector.extract_strided_slice %13 {offsets = [0, 0], sizes = [8, 32], strides = [1, 1]} : vector<8x64xf32> to vector<8x32xf32>
    %16 = arith.truncf %15 : vector<8x32xf32> to vector<8x32xbf16>
    %17 = vector.extract_strided_slice %13 {offsets = [0, 32], sizes = [8, 32], strides = [1, 1]} : vector<8x64xf32> to vector<8x32xf32>
    %18 = arith.truncf %17 : vector<8x32xf32> to vector<8x32xbf16>
    %19 = vector.extract_strided_slice %14 {offsets = [0, 0], sizes = [8, 8], strides = [1, 1]} : vector<8x32xbf16> to vector<8x8xbf16>
    %20 = vector.extract_strided_slice %16 {offsets = [0, 0], sizes = [8, 8], strides = [1, 1]} : vector<8x32xbf16> to vector<8x8xbf16>
    %21 = vector.extract_strided_slice %18 {offsets = [0, 0], sizes = [8, 8], strides = [1, 1]} : vector<8x32xbf16> to vector<8x8xbf16>
    "tpu.trace_start"() <{level = 10 : i32, message = "qd,kd->qk"}> : () -> ()
    %cst_12 = arith.constant dense<0.000000e+00> : vector<8x8xf32>
    %22 = tpu.matmul %19, %20, %cst_12 {dimension_numbers = #tpu.dot_dimension_numbers<[1], [1], [0], [0], [0, 0, 1, 0], [], []>} : vector<8x8xbf16>, vector<8x8xbf16>, vector<8x8xf32> -> vector<8x8xf32>
    "tpu.trace_stop"() : () -> ()
    %cst_13 = arith.constant dense<0xFF800000> : vector<8xf32>
    %23 = vector.multi_reduction <maximumf>, %22, %cst_13 [1] : vector<8x8xf32> to vector<8xf32>
    %24 = vector.shape_cast %23 : vector<8xf32> to vector<8x1xf32>
    %25 = vector.broadcast %24 : vector<8x1xf32> to vector<8x8xf32>
    %26 = arith.subf %22, %25 : vector<8x8xf32>
    %27 = math.exp %26 : vector<8x8xf32>
    %cst_14 = arith.constant dense<0.000000e+00> : vector<8xf32>
    %28 = vector.multi_reduction <add>, %27, %cst_14 [1] : vector<8x8xf32> to vector<8xf32>
    %29 = vector.shape_cast %28 : vector<8xf32> to vector<8x1xf32>
    %30 = tpu.reciprocal %29 {approx = true} : vector<8x1xf32> -> vector<8x1xf32>
    %31 = vector.broadcast %30 : vector<8x1xf32> to vector<8x8xf32>
    %32 = arith.mulf %27, %31 : vector<8x8xf32>
    %33 = arith.truncf %32 : vector<8x8xf32> to vector<8x8xbf16>
    %cst_15 = arith.constant dense<0.000000e+00> : vector<8x8xf32>
    %34 = tpu.matmul %33, %21, %cst_15 {dimension_numbers = #tpu.dot_dimension_numbers<[1], [0], [0], [1], [0, 0, 1, 1], [], []>} : vector<8x8xbf16>, vector<8x8xbf16>, vector<8x8xf32> -> vector<8x8xf32>
    %35 = arith.truncf %34 : vector<8x8xf32> to vector<8x8xbf16>
    %c0_16 = arith.constant 0 : index
    %c0_17 = arith.constant 0 : index
    %36 = vector.load %arg18[%c0_16, %c0_17] : memref<8x32xbf16, #tpu.memory_space<vmem>>, vector<8x8xbf16>
    tpu.vector_store %arg18[%c0_16, %c0_17], %35 {strides = array<i32>} : memref<8x32xbf16, #tpu.memory_space<vmem>>, vector<8x8xbf16>,
    %37 = vector.extract_strided_slice %14 {offsets = [0, 8], sizes = [8, 8], strides = [1, 1]} : vector<8x32xbf16> to vector<8x8xbf16>
    %38 = vector.extract_strided_slice %16 {offsets = [0, 8], sizes = [8, 8], strides = [1, 1]} : vector<8x32xbf16> to vector<8x8xbf16>
    %39 = vector.extract_strided_slice %18 {offsets = [0, 8], sizes = [8, 8], strides = [1, 1]} : vector<8x32xbf16> to vector<8x8xbf16>
    "tpu.trace_start"() <{level = 10 : i32, message = "qd,kd->qk"}> : () -> ()
    %cst_18 = arith.constant dense<0.000000e+00> : vector<8x8xf32>
    %40 = tpu.matmul %37, %38, %cst_18 {dimension_numbers = #tpu.dot_dimension_numbers<[1], [1], [0], [0], [0, 0, 1, 0], [], []>} : vector<8x8xbf16>, vector<8x8xbf16>, vector<8x8xf32> -> vector<8x8xf32>
    "tpu.trace_stop"() : () -> ()
    %cst_19 = arith.constant dense<0xFF800000> : vector<8xf32>
    %41 = vector.multi_reduction <maximumf>, %40, %cst_19 [1] : vector<8x8xf32> to vector<8xf32>
    %42 = vector.shape_cast %41 : vector<8xf32> to vector<8x1xf32>
    %43 = vector.broadcast %42 : vector<8x1xf32> to vector<8x8xf32>
    %44 = arith.subf %40, %43 : vector<8x8xf32>
    %45 = math.exp %44 : vector<8x8xf32>
    %cst_20 = arith.constant dense<0.000000e+00> : vector<8xf32>
    %46 = vector.multi_reduction <add>, %45, %cst_20 [1] : vector<8x8xf32> to vector<8xf32>
    %47 = vector.shape_cast %46 : vector<8xf32> to vector<8x1xf32>
    %48 = tpu.reciprocal %47 {approx = true} : vector<8x1xf32> -> vector<8x1xf32>
    %49 = vector.broadcast %48 : vector<8x1xf32> to vector<8x8xf32>
    %50 = arith.mulf %45, %49 : vector<8x8xf32>
    %51 = arith.truncf %50 : vector<8x8xf32> to vector<8x8xbf16>
    %cst_21 = arith.constant dense<0.000000e+00> : vector<8x8xf32>
    %52 = tpu.matmul %51, %39, %cst_21 {dimension_numbers = #tpu.dot_dimension_numbers<[1], [0], [0], [1], [0, 0, 1, 1], [], []>} : vector<8x8xbf16>, vector<8x8xbf16>, vector<8x8xf32> -> vector<8x8xf32>
    %53 = arith.truncf %52 : vector<8x8xf32> to vector<8x8xbf16>
    %c0_22 = arith.constant 0 : index
    %c8 = arith.constant 8 : index
    %54 = vector.load %arg18[%c0_22, %c8] : memref<8x32xbf16, #tpu.memory_space<vmem>>, vector<8x8xbf16>
    tpu.vector_store %arg18[%c0_22, %c8], %53 {strides = array<i32>} : memref<8x32xbf16, #tpu.memory_space<vmem>>, vector<8x8xbf16>,
    %55 = vector.extract_strided_slice %14 {offsets = [0, 16], sizes = [8, 8], strides = [1, 1]} : vector<8x32xbf16> to vector<8x8xbf16>
    %56 = vector.extract_strided_slice %16 {offsets = [0, 16], sizes = [8, 8], strides = [1, 1]} : vector<8x32xbf16> to vector<8x8xbf16>
    %57 = vector.extract_strided_slice %18 {offsets = [0, 16], sizes = [8, 8], strides = [1, 1]} : vector<8x32xbf16> to vector<8x8xbf16>
    "tpu.trace_start"() <{level = 10 : i32, message = "qd,kd->qk"}> : () -> ()
    %cst_23 = arith.constant dense<0.000000e+00> : vector<8x8xf32>
    %58 = tpu.matmul %55, %56, %cst_23 {dimension_numbers = #tpu.dot_dimension_numbers<[1], [1], [0], [0], [0, 0, 1, 0], [], []>} : vector<8x8xbf16>, vector<8x8xbf16>, vector<8x8xf32> -> vector<8x8xf32>
    "tpu.trace_stop"() : () -> ()
    %cst_24 = arith.constant dense<0xFF800000> : vector<8xf32>
    %59 = vector.multi_reduction <maximumf>, %58, %cst_24 [1] : vector<8x8xf32> to vector<8xf32>
    %60 = vector.shape_cast %59 : vector<8xf32> to vector<8x1xf32>
    %61 = vector.broadcast %60 : vector<8x1xf32> to vector<8x8xf32>
    %62 = arith.subf %58, %61 : vector<8x8xf32>
    %63 = math.exp %62 : vector<8x8xf32>
    %cst_25 = arith.constant dense<0.000000e+00> : vector<8xf32>
    %64 = vector.multi_reduction <add>, %63, %cst_25 [1] : vector<8x8xf32> to vector<8xf32>
    %65 = vector.shape_cast %64 : vector<8xf32> to vector<8x1xf32>
    %66 = tpu.reciprocal %65 {approx = true} : vector<8x1xf32> -> vector<8x1xf32>
    %67 = vector.broadcast %66 : vector<8x1xf32> to vector<8x8xf32>
    %68 = arith.mulf %63, %67 : vector<8x8xf32>
    %69 = arith.truncf %68 : vector<8x8xf32> to vector<8x8xbf16>
    %cst_26 = arith.constant dense<0.000000e+00> : vector<8x8xf32>
    %70 = tpu.matmul %69, %57, %cst_26 {dimension_numbers = #tpu.dot_dimension_numbers<[1], [0], [0], [1], [0, 0, 1, 1], [], []>} : vector<8x8xbf16>, vector<8x8xbf16>, vector<8x8xf32> -> vector<8x8xf32>
    %71 = arith.truncf %70 : vector<8x8xf32> to vector<8x8xbf16>
    %c0_27 = arith.constant 0 : index
    %c16 = arith.constant 16 : index
    %72 = vector.load %arg18[%c0_27, %c16] : memref<8x32xbf16, #tpu.memory_space<vmem>>, vector<8x8xbf16>
    tpu.vector_store %arg18[%c0_27, %c16], %71 {strides = array<i32>} : memref<8x32xbf16, #tpu.memory_space<vmem>>, vector<8x8xbf16>,
    %73 = vector.extract_strided_slice %14 {offsets = [0, 24], sizes = [8, 8], strides = [1, 1]} : vector<8x32xbf16> to vector<8x8xbf16>
    %74 = vector.extract_strided_slice %16 {offsets = [0, 24], sizes = [8, 8], strides = [1, 1]} : vector<8x32xbf16> to vector<8x8xbf16>
    %75 = vector.extract_strided_slice %18 {offsets = [0, 24], sizes = [8, 8], strides = [1, 1]} : vector<8x32xbf16> to vector<8x8xbf16>
    "tpu.trace_start"() <{level = 10 : i32, message = "qd,kd->qk"}> : () -> ()
    %cst_28 = arith.constant dense<0.000000e+00> : vector<8x8xf32>
    %76 = tpu.matmul %73, %74, %cst_28 {dimension_numbers = #tpu.dot_dimension_numbers<[1], [1], [0], [0], [0, 0, 1, 0], [], []>} : vector<8x8xbf16>, vector<8x8xbf16>, vector<8x8xf32> -> vector<8x8xf32>
    "tpu.trace_stop"() : () -> ()
    %cst_29 = arith.constant dense<0xFF800000> : vector<8xf32>
    %77 = vector.multi_reduction <maximumf>, %76, %cst_29 [1] : vector<8x8xf32> to vector<8xf32>
    %78 = vector.shape_cast %77 : vector<8xf32> to vector<8x1xf32>
    %79 = vector.broadcast %78 : vector<8x1xf32> to vector<8x8xf32>
    %80 = arith.subf %76, %79 : vector<8x8xf32>
    %81 = math.exp %80 : vector<8x8xf32>
    %cst_30 = arith.constant dense<0.000000e+00> : vector<8xf32>
    %82 = vector.multi_reduction <add>, %81, %cst_30 [1] : vector<8x8xf32> to vector<8xf32>
    %83 = vector.shape_cast %82 : vector<8xf32> to vector<8x1xf32>
    %84 = tpu.reciprocal %83 {approx = true} : vector<8x1xf32> -> vector<8x1xf32>
    %85 = vector.broadcast %84 : vector<8x1xf32> to vector<8x8xf32>
    %86 = arith.mulf %81, %85 : vector<8x8xf32>
    %87 = arith.truncf %86 : vector<8x8xf32> to vector<8x8xbf16>
    %cst_31 = arith.constant dense<0.000000e+00> : vector<8x8xf32>
    %88 = tpu.matmul %87, %75, %cst_31 {dimension_numbers = #tpu.dot_dimension_numbers<[1], [0], [0], [1], [0, 0, 1, 1], [], []>} : vector<8x8xbf16>, vector<8x8xbf16>, vector<8x8xf32> -> vector<8x8xf32>
    %89 = arith.truncf %88 : vector<8x8xf32> to vector<8x8xbf16>
    %c0_32 = arith.constant 0 : index
    %c24 = arith.constant 24 : index
    %90 = vector.load %arg18[%c0_32, %c24] : memref<8x32xbf16, #tpu.memory_space<vmem>>, vector<8x8xbf16>
    tpu.vector_store %arg18[%c0_32, %c24], %89 {strides = array<i32>} : memref<8x32xbf16, #tpu.memory_space<vmem>>, vector<8x8xbf16>,
    %c0_33 = arith.constant 0 : index
    %c0_34 = arith.constant 0 : index
    %91 = vector.load %arg18[%c0_33, %c0_34] : memref<8x32xbf16, #tpu.memory_space<vmem>>, vector<8x32xbf16>
    %c0_35 = arith.constant 0 : index
    %c0_36 = arith.constant 0 : index
    %92 = vector.load %arg7[%c0_35, %c0_36] : memref<32x32xbf16, #tpu.memory_space<vmem>>, vector<32x32xbf16>
    %cst_37 = arith.constant dense<0.000000e+00> : vector<8x32xf32>
    %93 = tpu.matmul %91, %92, %cst_37 {dimension_numbers = #tpu.dot_dimension_numbers<[1], [0], [0], [1], [0, 0, 1, 1], [], []>} : vector<8x32xbf16>, vector<32x32xbf16>, vector<8x32xf32> -> vector<8x32xf32>
    %c0_38 = arith.constant 0 : index
    %c0_39 = arith.constant 0 : index
    %94 = vector.load %arg8[%c0_38, %c0_39] : memref<1x32xf32, #tpu.memory_space<vmem>>, vector<1x32xf32>
    %95 = vector.broadcast %94 : vector<1x32xf32> to vector<8x32xf32>
    %96 = arith.addf %93, %95 : vector<8x32xf32>
    %c0_40 = arith.constant 0 : index
    %c0_41 = arith.constant 0 : index
    %97 = vector.load %arg1[%c0_40, %c0_41] : memref<8x32xf32, #tpu.memory_space<vmem>>, vector<8x32xf32>
    %98 = arith.addf %97, %96 : vector<8x32xf32>
    %c0_42 = arith.constant 0 : index
    %c0_43 = arith.constant 0 : index
    %99 = vector.load %arg13[%c0_42, %c0_43] : memref<1x32xf32, #tpu.memory_space<vmem>>, vector<1x32xf32>
    %c0_44 = arith.constant 0 : index
    %c0_45 = arith.constant 0 : index
    %100 = vector.load %arg14[%c0_44, %c0_45] : memref<1x32xf32, #tpu.memory_space<vmem>>, vector<1x32xf32>
    %cst_46 = arith.constant dense<0.000000e+00> : vector<8xf32>
    %101 = vector.multi_reduction <add>, %98, %cst_46 [1] : vector<8x32xf32> to vector<8xf32>
    %102 = vector.shape_cast %101 : vector<8xf32> to vector<8x1xf32>
    %cst_47 = arith.constant 3.125000e-02 : f32
    %103 = vector.broadcast %cst_47 : f32 to vector<8x1xf32>
    %104 = arith.mulf %102, %103 : vector<8x1xf32>
    %105 = arith.mulf %98, %98 : vector<8x32xf32>
    %cst_48 = arith.constant dense<0.000000e+00> : vector<8xf32>
    %106 = vector.multi_reduction <add>, %105, %cst_48 [1] : vector<8x32xf32> to vector<8xf32>
    %107 = vector.shape_cast %106 : vector<8xf32> to vector<8x1xf32>
    %cst_49 = arith.constant 3.125000e-02 : f32
    %108 = vector.broadcast %cst_49 : f32 to vector<8x1xf32>
    %109 = arith.mulf %107, %108 : vector<8x1xf32>
    %110 = arith.mulf %104, %104 : vector<8x1xf32>
    %111 = arith.subf %109, %110 : vector<8x1xf32>
    %112 = vector.broadcast %104 : vector<8x1xf32> to vector<8x32xf32>
    %113 = arith.subf %98, %112 : vector<8x32xf32>
    %cst_50 = arith.constant 9.99999974E-6 : f32
    %114 = vector.broadcast %cst_50 : f32 to vector<8x1xf32>
    %115 = arith.addf %111, %114 : vector<8x1xf32>
    %116 = math.rsqrt %115 : vector<8x1xf32>
    %117 = vector.broadcast %116 : vector<8x1xf32> to vector<8x32xf32>
    %118 = arith.mulf %113, %117 : vector<8x32xf32>
    %119 = vector.broadcast %99 : vector<1x32xf32> to vector<8x32xf32>
    %120 = arith.mulf %118, %119 : vector<8x32xf32>
    %121 = vector.broadcast %100 : vector<1x32xf32> to vector<8x32xf32>
    %122 = arith.addf %120, %121 : vector<8x32xf32>
    %123 = arith.truncf %122 : vector<8x32xf32> to vector<8x32xbf16>
    %c0_51 = arith.constant 0 : index
    %c0_52 = arith.constant 0 : index
    %124 = vector.load %arg9[%c0_51, %c0_52] : memref<32x128xbf16, #tpu.memory_space<vmem>>, vector<32x128xbf16>
    %cst_53 = arith.constant dense<0.000000e+00> : vector<8x128xf32>
    %125 = tpu.matmul %123, %124, %cst_53 {dimension_numbers = #tpu.dot_dimension_numbers<[1], [0], [0], [1], [0, 0, 1, 1], [], []>} : vector<8x32xbf16>, vector<32x128xbf16>, vector<8x128xf32> -> vector<8x128xf32>
    %c0_54 = arith.constant 0 : index
    %c0_55 = arith.constant 0 : index
    %126 = vector.load %arg10[%c0_54, %c0_55] : memref<1x128xf32, #tpu.memory_space<vmem>>, vector<1x128xf32>
    %127 = vector.broadcast %126 : vector<1x128xf32> to vector<8x128xf32>
    %128 = arith.addf %125, %127 : vector<8x128xf32>
    %cst_56 = arith.constant 0.000000e+00 : f32
    %129 = vector.broadcast %cst_56 : f32 to vector<8x128xf32>
    %130 = arith.maximumf %128, %129 : vector<8x128xf32>
    %131 = arith.truncf %130 : vector<8x128xf32> to vector<8x128xbf16>
    %c0_57 = arith.constant 0 : index
    %c0_58 = arith.constant 0 : index
    %132 = vector.load %arg11[%c0_57, %c0_58] : memref<128x32xbf16, #tpu.memory_space<vmem>>, vector<128x32xbf16>
    %cst_59 = arith.constant dense<0.000000e+00> : vector<8x32xf32>
    %133 = tpu.matmul %131, %132, %cst_59 {dimension_numbers = #tpu.dot_dimension_numbers<[1], [0], [0], [1], [0, 0, 1, 1], [], []>} : vector<8x128xbf16>, vector<128x32xbf16>, vector<8x32xf32> -> vector<8x32xf32>
    %c0_60 = arith.constant 0 : index
    %c0_61 = arith.constant 0 : index
    %134 = vector.load %arg12[%c0_60, %c0_61] : memref<1x32xf32, #tpu.memory_space<vmem>>, vector<1x32xf32>
    %135 = vector.broadcast %134 : vector<1x32xf32> to vector<8x32xf32>
    %136 = arith.addf %133, %135 : vector<8x32xf32>
    %137 = arith.addf %98, %136 : vector<8x32xf32>
    %c0_62 = arith.constant 0 : index
    %c0_63 = arith.constant 0 : index
    %138 = vector.load %arg15[%c0_62, %c0_63] : memref<1x32xf32, #tpu.memory_space<vmem>>, vector<1x32xf32>
    %c0_64 = arith.constant 0 : index
    %c0_65 = arith.constant 0 : index
    %139 = vector.load %arg16[%c0_64, %c0_65] : memref<1x32xf32, #tpu.memory_space<vmem>>, vector<1x32xf32>
    %cst_66 = arith.constant dense<0.000000e+00> : vector<8xf32>
    %140 = vector.multi_reduction <add>, %137, %cst_66 [1] : vector<8x32xf32> to vector<8xf32>
    %141 = vector.shape_cast %140 : vector<8xf32> to vector<8x1xf32>
    %cst_67 = arith.constant 3.125000e-02 : f32
    %142 = vector.broadcast %cst_67 : f32 to vector<8x1xf32>
    %143 = arith.mulf %141, %142 : vector<8x1xf32>
    %144 = arith.mulf %137, %137 : vector<8x32xf32>
    %cst_68 = arith.constant dense<0.000000e+00> : vector<8xf32>
    %145 = vector.multi_reduction <add>, %144, %cst_68 [1] : vector<8x32xf32> to vector<8xf32>
    %146 = vector.shape_cast %145 : vector<8xf32> to vector<8x1xf32>
    %cst_69 = arith.constant 3.125000e-02 : f32
    %147 = vector.broadcast %cst_69 : f32 to vector<8x1xf32>
    %148 = arith.mulf %146, %147 : vector<8x1xf32>
    %149 = arith.mulf %143, %143 : vector<8x1xf32>
    %150 = arith.subf %148, %149 : vector<8x1xf32>
    %151 = vector.broadcast %143 : vector<8x1xf32> to vector<8x32xf32>
    %152 = arith.subf %137, %151 : vector<8x32xf32>
    %cst_70 = arith.constant 9.99999974E-6 : f32
    %153 = vector.broadcast %cst_70 : f32 to vector<8x1xf32>
    %154 = arith.addf %150, %153 : vector<8x1xf32>
    %155 = math.rsqrt %154 : vector<8x1xf32>
    %156 = vector.broadcast %155 : vector<8x1xf32> to vector<8x32xf32>
    %157 = arith.mulf %152, %156 : vector<8x32xf32>
    %158 = vector.broadcast %138 : vector<1x32xf32> to vector<8x32xf32>
    %159 = arith.mulf %157, %158 : vector<8x32xf32>
    %160 = vector.broadcast %139 : vector<1x32xf32> to vector<8x32xf32>
    %161 = arith.addf %159, %160 : vector<8x32xf32>
    %c0_71 = arith.constant 0 : index
    %c0_72 = arith.constant 0 : index
    %162 = vector.load %arg17[%c0_71, %c0_72] : memref<8x32xf32, #tpu.memory_space<vmem>>, vector<8x32xf32>
    tpu.vector_store %arg17[%c0_71, %c0_72], %161 {strides = array<i32>} : memref<8x32xf32, #tpu.memory_space<vmem>>, vector<8x32xf32>,
    return
  }
  func.func @transform_0(%arg0: i32) -> (i32, i32) {
    %c0_i32 = arith.constant 0 : i32
    %c0_i32_0 = arith.constant 0 : i32
    return %arg0, %c0_i32 : i32, i32
  }
  func.func @transform_1(%arg0: i32) -> (i32, i32) {
    %c0_i32 = arith.constant 0 : i32
    %c0_i32_0 = arith.constant 0 : i32
    return %arg0, %c0_i32 : i32, i32
  }
  func.func @transform_2(%arg0: i32) -> (i32, i32) {
    %c0_i32 = arith.constant 0 : i32
    %c0_i32_0 = arith.constant 0 : i32
    %c0_i32_1 = arith.constant 0 : i32
    return %c0_i32, %c0_i32_0 : i32, i32
  }
  func.func @transform_3(%arg0: i32) -> (i32, i32) {
    %c0_i32 = arith.constant 0 : i32
    %c0_i32_0 = arith.constant 0 : i32
    %c0_i32_1 = arith.constant 0 : i32
    return %c0_i32, %c0_i32_0 : i32, i32
  }
  func.func @transform_4(%arg0: i32) -> (i32, i32) {
    %c0_i32 = arith.constant 0 : i32
    %c0_i32_0 = arith.constant 0 : i32
    %c0_i32_1 = arith.constant 0 : i32
    return %c0_i32, %c0_i32_0 : i32, i32
  }
  func.func @transform_5(%arg0: i32) -> (i32, i32) {
    %c0_i32 = arith.constant 0 : i32
    %c0_i32_0 = arith.constant 0 : i32
    %c0_i32_1 = arith.constant 0 : i32
    return %c0_i32, %c0_i32_0 : i32, i32
  }
  func.func @transform_6(%arg0: i32) -> (i32, i32) {
    %c0_i32 = arith.constant 0 : i32
    %c0_i32_0 = arith.constant 0 : i32
    %c0_i32_1 = arith.constant 0 : i32
    return %c0_i32, %c0_i32_0 : i32, i32
  }
  func.func @transform_7(%arg0: i32) -> (i32, i32) {
    %c0_i32 = arith.constant 0 : i32
    %c0_i32_0 = arith.constant 0 : i32
    %c0_i32_1 = arith.constant 0 : i32
    return %c0_i32, %c0_i32_0 : i32, i32
  }
  func.func @transform_8(%arg0: i32) -> (i32, i32) {
    %c0_i32 = arith.constant 0 : i32
    %c0_i32_0 = arith.constant 0 : i32
    %c0_i32_1 = arith.constant 0 : i32
    return %c0_i32, %c0_i32_0 : i32, i32
  }
  func.func @transform_9(%arg0: i32) -> (i32, i32) {
    %c0_i32 = arith.constant 0 : i32
    %c0_i32_0 = arith.constant 0 : i32
    %c0_i32_1 = arith.constant 0 : i32
    return %c0_i32, %c0_i32_0 : i32, i32
  }
  func.func @transform_10(%arg0: i32) -> (i32, i32) {
    %c0_i32 = arith.constant 0 : i32
    %c0_i32_0 = arith.constant 0 : i32
    %c0_i32_1 = arith.constant 0 : i32
    return %c0_i32, %c0_i32_0 : i32, i32
  }
  func.func @transform_11(%arg0: i32) -> (i32, i32) {
    %c0_i32 = arith.constant 0 : i32
    %c0_i32_0 = arith.constant 0 : i32
    %c0_i32_1 = arith.constant 0 : i32
    return %c0_i32, %c0_i32_0 : i32, i32
  }
  func.func @transform_12(%arg0: i32) -> (i32, i32) {
    %c0_i32 = arith.constant 0 : i32
    %c0_i32_0 = arith.constant 0 : i32
    %c0_i32_1 = arith.constant 0 : i32
    return %c0_i32, %c0_i32_0 : i32, i32
  }
  func.func @transform_13(%arg0: i32) -> (i32, i32) {
    %c0_i32 = arith.constant 0 : i32
    %c0_i32_0 = arith.constant 0 : i32
    %c0_i32_1 = arith.constant 0 : i32
    return %c0_i32, %c0_i32_0 : i32, i32
  }
  func.func @transform_14(%arg0: i32) -> (i32, i32) {
    %c0_i32 = arith.constant 0 : i32
    %c0_i32_0 = arith.constant 0 : i32
    %c0_i32_1 = arith.constant 0 : i32
    return %c0_i32, %c0_i32_0 : i32, i32
  }
  func.func @transform_15(%arg0: i32) -> (i32, i32) {
    %c0_i32 = arith.constant 0 : i32
    %c0_i32_0 = arith.constant 0 : i32
    %c0_i32_1 = arith.constant 0 : i32
    return %c0_i32, %c0_i32_0 : i32, i32
  }
  func.func @transform_16(%arg0: i32) -> (i32, i32) {
    %c0_i32 = arith.constant 0 : i32
    %c0_i32_0 = arith.constant 0 : i32
    return %arg0, %c0_i32 : i32, i32
  }
}

</mosaic_0001>

<bundles_post_ra>
// kernel: tpu_custom_call.1
= control target key start
LH: loop header
LB: loop body
LE: loop exit
PB: predicated region body
PF: predicated region fallthrough
CT: control target
= control target key end

     0   :  { %s2567_s0 = inlined_call_operand.vmem [shape: f32[32,32], index: 0, kind: input, shape index: {}]   ;;  %s2568_s1 = inlined_call_operand.vmem [shape: f32[32,32], index: 1, kind: input, shape index: {}]   ;;  %s2569_s2 = inlined_call_operand.vmem [shape: bf16[32,32], index: 2, kind: input, shape index: {}]   ;;  %s2570_s3 = inlined_call_operand.vmem [shape: f32[1,32], index: 3, kind: input, shape index: {}]   ;;  %s2571_s4 = inlined_call_operand.hbm [shape: bf16[32,64], index: 4, kind: input, shape index: {}]   ;;  %s2572_s5 = inlined_call_operand.vmem [shape: f32[1,64], index: 5, kind: input, shape index: {}]   ;;  %s2573_s6 = inlined_call_operand.hbm [shape: bf16[32,32], index: 6, kind: input, shape index: {}]   ;;  %s2574_s7 = inlined_call_operand.vmem [shape: f32[1,32], index: 7, kind: input, shape index: {}]   ;;  %s2575_s8 = inlined_call_operand.hbm [shape: bf16[32,128], index: 8, kind: input, shape index: {}]   ;;  %s2576_s9 = inlined_call_operand.vmem [shape: f32[1,128], index: 9, kind: input, shape index: {}]   ;;  %s2577_s10 = inlined_call_operand.vmem [shape: bf16[128,32], index: 10, kind: input, shape index: {}]   ;;  %s2578_s11 = inlined_call_operand.vmem [shape: f32[1,32], index: 11, kind: input, shape index: {}]   ;;  %s2579_s12 = inlined_call_operand.vmem [shape: f32[1,32], index: 12, kind: input, shape index: {}]   ;;  %s2580_s13 = inlined_call_operand.vmem [shape: f32[1,32], index: 13, kind: input, shape index: {}]   ;;  %s2581_s14 = inlined_call_operand.vmem [shape: f32[1,32], index: 14, kind: input, shape index: {}]   ;;  %s2582_s15 = inlined_call_operand.vmem [shape: f32[1,32], index: 15, kind: input, shape index: {}]   ;;  %s2583_s16 = inlined_call_operand.hbm [shape: f32[32,32], index: 16, kind: output, shape index: {}]  }
   0x1   :  { %2597 = sst [smem:[#allocation21_spill]] %s2567_s0 }
   0x2   :  { %2598 = sst [smem:[#allocation22_spill]] %s2581_s14 }
   0x3   :  { %2599 = sst [smem:[#allocation23_spill]] %s2582_s15 }
   0x4   :  { %2600 = sst [smem:[#allocation24_spill]] %s2583_s16 }
   0x5   :  { %21 = vsyncpa [#allocation4], 0 }
   0x6   :  { %22 = vsyncpa [#allocation7], 0 }
   0x7   :  { %23 = vsyncpa [#allocation5], 0 }
   0x8   :  { %25 = vsyncpa [#allocation5 + $0x1], 0  ;;  %s2193_s21 = smov 0   ;;  %s2195_s22 = smov 0  }
   0x9   :  { %s2197_s23 = smov 0   ;;  %s2199_s24 = smov 0  }
   0xa LB: > { %2601 = sst [smem:[#allocation13_spill]] %s2076_s21  ;;  %s2214_s25 = sadd.s32 4294967295, %s2088_s24   ;;  %s2088_s24 = sphi %s2199_s24, %s2630_s24   ;;  %s2084_s23 = sphi %s2197_s23, %s2633_s23   ;;  %s2080_s22 = sphi %s2195_s22, %s2632_s22   ;;  %s2076_s21 = sphi %s2193_s21, %s2631_s21  }
   0xb   : > { %2602 = sst [smem:[#allocation14_spill]] %s2080_s22  ;;  %s1617_s26 = sadd.s32 4294967294, %s2088_s24  }
   0xc   : > { %2603 = sst [smem:[#allocation15_spill]] %s2084_s23  ;;  %s2218_s27 = sadd.s32 1, %s2088_s24  }
   0xd   : > { %2604 = sst [smem:[#allocation16_spill]] %s2088_s24  ;;  %s384_s28 = sadd.s32 1, %s2084_s23 }
   0xe   : > { %2605 = sst [smem:[#allocation17_spill]] %s2218_s27  ;;  %s381_s29 = ssub.s32 %s2088_s24, %s2218_s27 }
   0xf   : > { %p394_p0 = scmp.ne.s32.totalorder %s2084_s23, %s2080_s22  ;;  %p382_p1 = scmp.eq.s32.totalorder %s381_s29, 0 }
  0x10   : > { %p395_p2 = scmp.eq.s32.totalorder %s2214_s25, 3  ;;  %p400_p3 = scmp.ne.s32.totalorder %s2080_s22, %s2076_s21 }
  0x11   : > { %p401_p4 = scmp.eq.s32.totalorder %s1617_s26, 3  ;;  %p1618_p7 = scmp.ge.s32.totalorder %s2088_s24, 1 }
  0x12   : > { %s2229_s30 = scalar_select %p382_p1, %s2084_s23, %s384_s28  }
  0x13   : > { %p2231_p5 = por %p395_p2, %p394_p0  ;;  %p2235_p6 = por %p401_p4, %p400_p3 }
  0x14   : > { %2606 = sst [smem:[#allocation18_spill]] %s2229_s30  ;;  %p408_p8 = scmp.lt.s32.totalorder %s2088_s24, 5 }
  0x15   : > { %s2607_s0 = scalar_select %p2231_p5, 1, 0 }
  0x16   : > { %s2609_s17 = scalar_select %p2235_p6, 1, 0 }
  0x17   : > { %2608 = sst [smem:[#allocation19_spill]] %s2607_s0  ;;  %p2591_p9 = scmp.eq.s32.totalorder %s2214_s25, 0 }
  0x18   : > { %2610 = sst [smem:[#allocation20_spill]] %s2609_s17  ;;  %p2242_p10 = pnand %p1618_p7, %p408_p8 }
  0x19   : > { %s2090_s19 = smov [#allocation6]   ;;  %s2091_s28 = smov [#allocation3]  }
  0x1a   : > { %s2611_s18 = scalar_select %p2242_p10, 1, 0 }
  0x1b   : > { %p1828_p11 = pneg %p2242_p10  ;;  %s442_s20 = sshll.u32 %s2090_s19, 4  ;;  %s2248_s20 = int_to_ptr.vmem [resolvable:$true] %s442_s20 }
  0x1c   : > { %s426_s29 = sshll.u32 %s2091_s28, 4  ;;  %s2092_s30 = smov [#allocation8]   ;;  %s2256_s29 = int_to_ptr.vmem [resolvable:$true] %s426_s29 }
  0x1d   : > { %p2252_p12 = pnand %p2591_p9, %p1828_p11  ;;  %s2258_s23 = sshll.u32 %s2092_s30, 4  ;;  %s459_s23 = int_to_ptr.vmem [resolvable:$true] %s2258_s23 }
  0x1e   : > { %s1934_s21 = scalar_lea.hbm %s2573_s6, 256 }
  0x1f   : > { %p1935_p13 = scmp.ne.s32.totalorder %s2573_s6, %s1934_s21  ;;  %p2268_p0 = pneg %p2252_p12 }
  0x20   : > { %p1941_p3 = scmp.lt.u32.totalorder %s1934_s21, %s2573_s6 }
  0x21   : > { %p1937_p1 = pnand %p2268_p0, %p1935_p13 }
  0x23   : > { %p1938_p2 = pneg %p1937_p1 }
  0x25   : > { %p1943_p4 = pnand %p1941_p3, %p1938_p2 }
  0x27   : > { %1946 = shalt.err (!%p1943_p4)
}
  0x28   : > { %s1947_s24 = scalar_lea.vmem %s2248_s20, 256  ;;  %p1955_p9 = scmp.lt.s32.totalorder %s2248_s20, %s2248_s20 }
  0x29   : > { %p1948_p7 = scmp.ne.s32.totalorder %s2248_s20, %s1947_s24  ;;  %p1956_p6 = scmp.lt.s32.totalorder %s1947_s24, %s1947_s24 }
  0x2b   : > { %p1950_p8 = pnand %p1948_p7, %p2268_p0  ;;  %p1957_p13 = por %p1956_p6, %p1955_p9 }
  0x2d   : > { %p1951_p11 = pneg %p1950_p8 }
  0x2f   : > { %p1958_p1 = pnand %p1957_p13, %p1951_p11 }
  0x31   : > { %1961 = shalt.err (!%p1958_p1)
}
  0x32   : > { %s2093_s27 = smov 64   ;;  %s2094_s21 = smov 4  }
  0x33   : > { %1834 = dma.hbm_to_vmem [thread:$0]  (!%p2252_p12), %s2573_s6, 256, %s2248_s20, [#allocation7], %s2093_s27, %s2093_s27, %s2094_s21  }
  0x34   : > { %s1962_s24 = scalar_lea.hbm %s2571_s4, 256 }
  0x35   : > { %p1963_p6 = scmp.ne.s32.totalorder %s2571_s4, %s1962_s24  ;;  %p1969_p3 = scmp.lt.u32.totalorder %s1962_s24, %s2571_s4 }
  0x37   : > { %p1965_p9 = pnand %p1963_p6, %p2268_p0 }
  0x39   : > { %p1966_p2 = pneg %p1965_p9 }
  0x3b   : > { %p1971_p4 = pnand %p1969_p3, %p1966_p2 }
  0x3d   : > { %1974 = shalt.err (!%p1971_p4)
}
  0x3e   : > { %s1975_s20 = scalar_lea.vmem %s2256_s29, 256  ;;  %p1983_p13 = scmp.lt.s32.totalorder %s2256_s29, %s2256_s29 }
  0x3f   : > { %p1976_p7 = scmp.ne.s32.totalorder %s2256_s29, %s1975_s20  ;;  %p1984_p1 = scmp.lt.s32.totalorder %s1975_s20, %s1975_s20 }
  0x41   : > { %p1978_p8 = pnand %p1976_p7, %p2268_p0  ;;  %p1985_p6 = por %p1984_p1, %p1983_p13 }
  0x43   : > { %p1979_p11 = pneg %p1978_p8 }
  0x45   : > { %p1986_p9 = pnand %p1985_p6, %p1979_p11 }
  0x47   : > { %1989 = shalt.err (!%p1986_p9)
}
  0x48   : > { %1831 = dma.hbm_to_vmem [thread:$0]  (!%p2252_p12), %s2571_s4, 256, %s2256_s29, [#allocation4], %s2093_s27, %s2093_s27, %s2094_s21  }
  0x49   : > { %s1990_s17 = scalar_lea.hbm %s2575_s8, 256 }
  0x4a   : > { %p1991_p2 = scmp.ne.s32.totalorder %s2575_s8, %s1990_s17  ;;  %p1997_p7 = scmp.lt.u32.totalorder %s1990_s17, %s2575_s8 }
  0x4c   : > { %p1993_p3 = pnand %p1991_p2, %p2268_p0 }
  0x4e   : > { %p1994_p4 = pneg %p1993_p3 }
  0x50   : > { %p1999_p8 = pnand %p1997_p7, %p1994_p4 }
  0x52   : > { %2002 = shalt.err (!%p1999_p8)
}
  0x53   : > { %s2003_s20 = scalar_lea.vmem %s459_s23, 256  ;;  %p2011_p6 = scmp.lt.s32.totalorder %s459_s23, %s459_s23 }
  0x54   : > { %p2004_p11 = scmp.ne.s32.totalorder %s459_s23, %s2003_s20  ;;  %p2012_p9 = scmp.lt.s32.totalorder %s2003_s20, %s2003_s20 }
  0x56   : > { %p2006_p13 = pnand %p2004_p11, %p2268_p0  ;;  %p2013_p5 = por %p2012_p9, %p2011_p6 }
  0x58   : > { %p2007_p1 = pneg %p2006_p13 }
  0x5a   : > { %p2014_p10 = pnand %p2013_p5, %p2007_p1 }
  0x5c   : > { %2017 = shalt.err (!%p2014_p10)
}
  0x5d   : > { %1837 = dma.hbm_to_vmem [thread:$0]  (!%p2252_p12), %s2575_s8, 256, %s459_s23, [#allocation7], %s2093_s27, %s2093_s27, %s2094_s21  }
  0x5e   : > { %p2614_p2 = scmp.ne.s32.totalorder %s2611_s18, 0 }
  0x5f   : > { %p2615_p0 = scmp.eq.s32.totalorder (!%p2614_p2), %s2214_s25, 0 }
  0x60   : > { %509 = sbr.rel (%p2614_p2) target bundleno = 2356 (0x934), region = 84 }
  0x67   : > { %2063 = dma.done.wait (%p2615_p0), [#allocation4], 256   ;;  %p2616_p3 = pmov %p2615_p0 }
  0x68   : > { %p2617_p5 = pmov %p2615_p0 }
  0x69   : > { %2065 = vsyncadd (%p2616_p3), [#allocation4], 4294967040 }
  0x6a   : > { %2067 = dma.done.wait (%p2617_p5), [#allocation7], 512   ;;  %p2618_p10 = pmov %p2615_p0 }
  0x6b   : > { %p570_p4 = scmp.lt.s32.totalorder %s2214_s25, 3  ;;  %v2095_v0 = vmov 0.0   ;;  %vm2096_vm0 = vmmov 0   ;;  %s2619_s27 = sld [smem:[#allocation21_spill]]  ;;  %v1898_v1 = vld [vmem:[%s2569_s2] sm:$0xff]   ;;  %v1899_v2 = vld [vmem:[%s2569_s2 + $0x8] sm:$0xff]  }
  0x6c   : > { %2069 = vsyncadd (%p2618_p10), [#allocation7], 4294966784  ;;  %1714 = vmatprep.subr.bf16.mxu1 %v2095_v0  ;;  %1718 = vmatprep.mubr.msk.bf16.mxu1 %vm2096_vm0, %v2095_v0  ;;  %vm606_vm1 = vcmask 261120   ;;  %v1900_v4 = vld [vmem:[#allocation3] sm:$0xff]   ;;  %v1901_v7 = vld [vmem:[#allocation3 + $0x8] sm:$0xff]   ;;  %vm718_vm2 = vcmask 64512  }
  0x6d   : > { %s571_s16 = scalar_select %p570_p4, %s2214_s25, 3  ;;  %1742 = vmatprep.subr.bf16.mxu0 %v2095_v0  ;;  %1744 = vmatprep.mubr.msk.bf16.mxu0 %vm2096_vm0, %v2095_v0  ;;  %v1634_v13 = vld [vmem:[%s2572_s5] ss:$0 sm:$0xff]  ;;  %vm783_vm3 = vcmask 1043456   ;;  %vm828_vm4 = vcmask 60416   ;;  %vm948_vm5 = vcmask 126016  }
  0x6e   : > { %1715 = vmatpush3.bf16.msra.mxu1 %v1898_v1  ;;  %v1630_v14 = vld [vmem:[%s2570_s3] ss:$0 sm:$0xff]  ;;  %s2099_s18 = smov 104   ;;  %s2100_s26 = smov 96   ;;  %vm1067_vm6 = vcmask 191616   ;;  %vm1186_vm7 = vcmask 257216  }
  0x6f   : > { %s1628_s23 = sshll.u32 %s571_s16, 3  ;;  %1716 = vmatprep.subr.bf16.mxu1 %v2095_v0  ;;  %s2097_s16 = smov 112  }
  0x70   : > { %s577_s30 = scalar_lea.vmem %s2568_s1, %s1628_s23  ;;  %s2103_s15 = smov 88  }
  0x71   : > { %s573_s21 = scalar_lea.vmem %s2619_s27, %s1628_s23  ;;  %v581_v6 = vld [vmem:[%s577_s30] sm:$0xff]  ;;  %s2098_s23 = smov 120  }
  0x72   : > { %v2367_v3 = vld [vmem:[%s573_s21] sm:$0xff]  ;;  %1717 = vmatpush3.bf16.msra.mxu1 %v1899_v2  ;;  %v582_v8 = vpack.c.bf16 %v581_v6, %v581_v6  ;;  %s2101_s27 = smov 80   ;;  %s2102_s21 = smov 72  }
  0x73   : > { %v580_v5 = vpack.c.bf16 %v2367_v3, %v2367_v3  ;;  %1722 = vmatprep.subr.bf16.mxu1 %v2095_v0  ;;  %s2104_s22 = smov 8   ;;  %s2105_s0 = smov 16  }
  0x74   : > { %s2106_s17 = smov 24   ;;  %s2623_s28 = sld [smem:[#allocation23_spill]] }
  0x75   : > { %1719 = vmatmul.mubr.msk.bf16.vlgmr.msra.gmra.mrb[0].mxu1 %vm606_vm1, %v580_v5  ;;  %s1671_s30 = sshll.u32 %s2214_s25, 7  ;;  %s2107_s25 = smov [#allocation9]  }
  0x76   : > { %1723 = vmatpush3.bf16.msra.mxu1 %v1900_v4  ;;  %1726 = vmatprep.mubr.msk.bf16.mxu1 %vm2096_vm0, %v2095_v0 }
  0x77   : > { %1724 = vmatprep.subr.bf16.mxu1 %v2095_v0 }
  0x7a   : > { %1725 = vmatpush3.bf16.msra.mxu1 %v1901_v7 }
  0x7b   : > { %1730 = vmatprep.subr.bf16.mxu1 %v2095_v0 }
  0x7d   : > { %1727 = vmatmul.mubr.msk.bf16.vlgmr.msra.gmra.mrb[4].mxu1 %vm606_vm1, %v582_v8 }
  0x7e   : > { %1732 = vmatprep.mubr.msk.bf16.mxu1 %vm2096_vm0, %v2095_v0 }
 0x148   : > { %v644_v9 = vpop.f32.mrb[0].mxu1 }
 0x149   : > { %v1720_v10 = vpop.f32.mrb[1].mxu1  ;;  %v645_v19 = vadd.f32 %v1630_v14, %v644_v9 }
 0x14a   : > { %v647_v11 = vpop.f32.mrb[2].mxu1 }
 0x14b   : > { %v1721_v12 = vpop.f32.mrb[3].mxu1  ;;  %v716_v23 = vpack.c.bf16 %v645_v19, %v645_v19 }
 0x150   : > { %v710_v15 = vpop.f32.mrb[4].mxu1 }
 0x151   : > { %v711_v16 = vadd.f32 %v1634_v13, %v710_v15  ;;  %v1728_v17 = vpop.f32.mrb[5].mxu1 }
 0x152   : > { %v713_v18 = vpop.f32.mrb[6].mxu1 }
 0x153   : > { %v2390_v20 = vpack.c.bf16 %v711_v16, %v711_v16  ;;  %v1729_v21 = vpop.f32.mrb[7].mxu1 }
 0x155   : > { %952 = vrot.lane.b32.xlu1 %v2390_v20, %s2097_s16  ;;  %833 = vrot.lane.b32.xlu0 %v2390_v20, %s2098_s23  ;;  %v723_v22 = vsel %vm718_vm2, %v2390_v20, 0 }
 0x156   : > { %1731 = vmatpush3.bf16.xpose.msra.mxu1 %v723_v22 }
 0x157   : > { %1736 = vmatprep.subr.bf16.mxu1 %v2095_v0 }
 0x159   : > { %950 = vrot.lane.b32.xlu1 %v716_v23, %s2097_s16  ;;  %831 = vrot.lane.b32.xlu0 %v716_v23, %s2098_s23  ;;  %s2624_s16 = sld [smem:[#allocation24_spill]] }
 0x15d   : > { %1069 = vrot.lane.b32.xlu1 %v716_v23, %s2099_s18  ;;  %1071 = vrot.lane.b32.xlu0 %v2390_v20, %s2099_s18  ;;  %s2620_s18 = sld [smem:[#allocation14_spill]] }
 0x15e   : > { %1733 = vmatmul.mubr.msk.bf16.vlgmr.msra.gmra.mrb[8].mxu1 %vm718_vm2, %v716_v23 }
 0x15f   : > { %1738 = vmatprep.mubr.msk.bf16.mxu1 %vm2096_vm0, %v2095_v0  ;;  %s2524_s23 = scalar_lea.hbm %s2624_s16, %s1671_s30 }
 0x1c7   : > { %v834_v24 = vpop.permute.xlu0 %833  ;;  %v953_v26 = vpop.permute.xlu1 %952 }
 0x1c8   : > { %v839_v25 = vsel %vm718_vm2, %v834_v24, 0  ;;  %v958_v28 = vsel %vm718_vm2, %v953_v26, 0 }
 0x1c9   : > { %1743 = vmatpush3.bf16.xpose.msra.mxu0 %v839_v25 }
 0x1ca   : > { %1754 = vmatprep.subr.bf16.mxu0 %v2095_v0 }
 0x1cb   : > { %v832_v27 = vpop.permute.xlu0 %831  ;;  %v951_v30 = vpop.permute.xlu1 %950 }
 0x1cf   : > { %v1072_v29 = vpop.permute.xlu0 %1071  ;;  %v1070_v32 = vpop.permute.xlu1 %1069 }
 0x1d0   : > { %1745 = vmatmul.mubr.msk.bf16.vlgmr.msra.gmra.mrb[0].mxu0 %vm718_vm2, %v832_v27  ;;  %v1077_v31 = vsel %vm718_vm2, %v1072_v29, 0 }
 0x1d1   : > { %1755 = vmatpush3.bf16.xpose.msra.mxu0 %v958_v28  ;;  %1756 = vmatprep.mubr.msk.bf16.mxu0 %vm2096_vm0, %v2095_v0 }
 0x1d2   : > { %1766 = vmatprep.subr.bf16.mxu0 %v2095_v0 }
 0x1d8   : > { %1757 = vmatmul.mubr.msk.bf16.vlgmr.msra.gmra.mrb[4].mxu0 %vm718_vm2, %v951_v30 }
 0x1d9   : > { %1767 = vmatpush3.bf16.xpose.msra.mxu0 %v1077_v31  ;;  %1768 = vmatprep.mubr.msk.bf16.mxu0 %vm2096_vm0, %v2095_v0 }
 0x1da   : > { %1778 = vmatprep.subr.bf16.mxu0 %v2095_v0 }
 0x1e0   : > { %1769 = vmatmul.mubr.msk.bf16.vlgmr.msra.gmra.mrb[8].mxu0 %vm718_vm2, %v1070_v32 }
 0x1e1   : > { %1782 = vmatprep.mubr.msk.bf16.mxu0 %vm2096_vm0, %v2095_v0 }
 0x231   : > { %v759_v33 = vpop.f32.mrb[8].mxu1 }
 0x232   : > { %v1734_v34 = vpop.f32.mrb[9].mxu1  ;;  %v765_v35 = vsel %vm718_vm2, %v759_v33, -inf }
 0x233   : > { %766 = vmax.xlane.f32.xlu0 %v765_v35  ;;  %v762_v36 = vpop.f32.mrb[10].mxu1 }
 0x234   : > { %v1735_v37 = vpop.f32.mrb[11].mxu1 }
 0x2a3   : > { %v875_v38 = vpop.f32.mrb[0].mxu0 }
 0x2a4   : > { %v1746_v39 = vpop.f32.mrb[1].mxu0  ;;  %v881_v40 = vsel %vm718_vm2, %v875_v38, -inf }
 0x2a5   : > { %882 = vmax.xlane.f32.xlu1 %v881_v40  ;;  %v878_v41 = vpop.f32.mrb[2].mxu0 }
 0x2a6   : > { %v1747_v42 = vpop.f32.mrb[3].mxu0 }
 0x2ab   : > { %v994_v43 = vpop.f32.mrb[4].mxu0 }
 0x2ac   : > { %v1758_v44 = vpop.f32.mrb[5].mxu0  ;;  %v1000_v45 = vsel %vm718_vm2, %v994_v43, -inf }
 0x2ad   : > { %v997_v46 = vpop.f32.mrb[6].mxu0  ;;  %1001 = vmax.xlane.f32.xlu0 %v1000_v45  ;;  %v1902_v45 = vld [vmem:[#allocation6] sm:$0xff]  }
 0x2ae   : > { %v1759_v47 = vpop.f32.mrb[7].mxu0  ;;  %1779 = vmatpush3.bf16.msra.mxu0 %v1902_v45 }
 0x2af   : > { %v1903_v47 = vld [vmem:[#allocation6 + $0x8] sm:$0xff]   ;;  %1780 = vmatprep.subr.bf16.mxu0 %v2095_v0 }
 0x2b2   : > { %1781 = vmatpush3.bf16.msra.mxu0 %v1903_v47 }
 0x2b3   : > { %v1113_v48 = vpop.f32.mrb[8].mxu0  ;;  %1794 = vmatprep.subr.bf16.mxu0 %v2095_v0 }
 0x2b4   : > { %v1770_v49 = vpop.f32.mrb[9].mxu0  ;;  %v1119_v50 = vsel %vm718_vm2, %v1113_v48, -inf }
 0x2b5   : > { %v1116_v51 = vpop.f32.mrb[10].mxu0  ;;  %1120 = vmax.xlane.f32.xlu0 %v1119_v50 }
 0x2b6   : > { %v1771_v52 = vpop.f32.mrb[11].mxu0 }
 0x2c0   : > { %v767_v53 = vpop.xlane.xlu0 %766 }
 0x2c1   : > { %v768_v54 = vsub.f32 %v759_v33, %v767_v53 }
 0x2c3   : > { %v769_v55 = vmul.f32 1.442695, %v768_v54 }
 0x2c5   : > { %1914 = vpow2.f32 %v769_v55 }
 0x2cf   : > { %v1915_v56 = vpop.eup %1914 }
 0x2d0   : > { %v771_v57 = vsel %vm718_vm2, %v1915_v56, 0.0 }
 0x2d1   : > { %772 = vadd.xlane.f32.xlu1 %v771_v57 }
 0x2e2   : > { %778 = vrot.lane.b32.xlu1 %v2390_v20, %s2100_s26  ;;  %s567_s26 = sand.u32 1, %s2620_s18  }
 0x2e3   : > { %s1502_s18 = scalar_lea.sflag [#allocation5], %s567_s26 }
 0x332   : > { %v883_v58 = vpop.xlane.xlu1 %882 }
 0x333   : > { %v884_v59 = vsub.f32 %v875_v38, %v883_v58 }
 0x335   : > { %v885_v60 = vmul.f32 1.442695, %v884_v59 }
 0x337   : > { %1916 = vpow2.f32 %v885_v60 }
 0x33a   : > { %v1002_v61 = vpop.xlane.xlu0 %1001 }
 0x33b   : > { %v1003_v62 = vsub.f32 %v994_v43, %v1002_v61  ;;  %v1649_v61 = vld [vmem:[%s2574_s7] ss:$0 sm:$0xff] }
 0x33d   : > { %v1004_v63 = vmul.f32 1.442695, %v1003_v62 }
 0x33f   : > { %1918 = vpow2.f32 %v1004_v63 }
 0x341   : > { %v1917_v1 = vpop.eup %1916 }
 0x342   : > { %v1121_v2 = vpop.xlane.xlu0 %1120  ;;  %v887_v4 = vsel %vm718_vm2, %v1917_v1, 0.0 }
 0x343   : > { %v1122_v5 = vsub.f32 %v1113_v48, %v1121_v2  ;;  %888 = vadd.xlane.f32.xlu0 %v887_v4 }
 0x345   : > { %v1123_v6 = vmul.f32 1.442695, %v1122_v5 }
 0x347   : > { %1920 = vpow2.f32 %v1123_v6 }
 0x349   : > { %v1919_v7 = vpop.eup %1918 }
 0x34a   : > { %v1006_v8 = vsel %vm718_vm2, %v1919_v7, 0.0 }
 0x34b   : > { %1007 = vadd.xlane.f32.xlu1 %v1006_v8 }
 0x351   : > { %v1921_v9 = vpop.eup %1920 }
 0x352   : > { %v1125_v10 = vsel %vm718_vm2, %v1921_v9, 0.0 }
 0x353   : > { %1126 = vadd.xlane.f32.xlu0 %v1125_v10  ;;  %v1905_v10 = vld [vmem:[#allocation8 + $0x8] sm:$0xff]  }
 0x35c   : > { %1012 = vrot.lane.b32.xlu1 %v2390_v20, %s2101_s27  ;;  %s1627_s27 = sshll.u32 %s567_s26, 3 }
 0x35d   : > { %s569_s24 = scalar_lea.vmem [#allocation9], %s1627_s27  ;;  %s2022_s27 = sshll.u32 %s2107_s25, 4  ;;  %s2023_s27 = int_to_ptr.vmem [resolvable:$false] %s2022_s27 }
 0x35e   : > { %v773_v11 = vpop.xlane.xlu1 %772  ;;  %s1515_s20 = sshll.u32 %s569_s24, 4  ;;  %s2526_s20 = int_to_ptr.vmem [resolvable:$true] %s1515_s20 }
 0x35f   : > { %1922 = vrcp.f32 %v773_v11  ;;  %v1907_v11 = vld [vmem:[%s2577_s10 + $0x8] sm:$0xff]   ;;  %p2025_p13 = scmp.lt.s32.totalorder %s2526_s20, %s2023_s27 }
 0x360   : > { %1131 = vrot.lane.b32.xlu1 %v2390_v20, %s2102_s21  ;;  %s2621_s21 = sld [smem:[#allocation19_spill]] }
 0x362   : > { %v779_v12 = vpop.permute.xlu1 %778 }
 0x363   : > { %v785_v13 = vsel %vm783_vm3, %v779_v12, 0  ;;  %v1908_v12 = vld [vmem:[%s2577_s10 + $0x10] sm:$0xff]  }
 0x364   : > { %1737 = vmatpush3.bf16.msra.mxu1 %v785_v13  ;;  %v1909_v13 = vld [vmem:[%s2577_s10 + $0x18] sm:$0xff]  }
 0x365   : > { %1748 = vmatprep.subr.bf16.mxu1 %v2095_v0 }
 0x366   : > { %p2625_p7 = scmp.ne.s32.totalorder %s2621_s21, 0 }
 0x369   : > { %v1923_v14 = vpop.eup %1922  ;;  %893 = vrot.lane.b32.xlu0 %v2390_v20, %s2103_s15  ;;  %s2018_s15 = scalar_lea.vmem %s2526_s20, 128 }
 0x36a   : > { %v775_v15 = vmul.f32 %v1923_v14, %v1915_v56  ;;  %v1910_v14 = vld [vmem:[%s2577_s10 + $0x20] sm:$0xff]   ;;  %p2019_p12 = scmp.ne.s32.totalorder %s2526_s20, %s2018_s15 }
 0x36c   : > { %v776_v16 = vpack.c.bf16 %v775_v15, %v775_v15  ;;  %v1911_v15 = vld [vmem:[%s2577_s10 + $0x28] sm:$0xff]   ;;  %p2020_p8 = pnand %p2019_p12, %p2625_p7 }
 0x36e   : > { %1739 = vmatmul.mubr.msk.bf16.vlgmr.msra.gmra.mrb[12].mxu1 %vm718_vm2, %v776_v16  ;;  %p2021_p11 = pneg %p2020_p8 }
 0x36f   : > { %1750 = vmatprep.mubr.msk.bf16.mxu1 %vm2096_vm0, %v2095_v0 }
 0x3d0   : > { %v889_v17 = vpop.xlane.xlu0 %888 }
 0x3d1   : > { %1924 = vrcp.f32 %v889_v17 }
 0x3d8   : > { %v1008_v18 = vpop.xlane.xlu1 %1007 }
 0x3d9   : > { %1926 = vrcp.f32 %v1008_v18 }
 0x3db   : > { %v1925_v19 = vpop.eup %1924 }
 0x3dc   : > { %v891_v22 = vmul.f32 %v1925_v19, %v1917_v1  ;;  %v1013_v25 = vpop.permute.xlu1 %1012 }
 0x3dd   : > { %v1018_v27 = vsel %vm783_vm3, %v1013_v25, 0 }
 0x3de   : > { %v892_v20 = vpack.c.bf16 %v891_v22, %v891_v22 }
 0x3e0   : > { %v1127_v21 = vpop.xlane.xlu0 %1126  ;;  %v1132_v29 = vpop.permute.xlu1 %1131 }
 0x3e1   : > { %1928 = vrcp.f32 %v1127_v21  ;;  %v1137_v32 = vsel %vm783_vm3, %v1132_v29, 0 }
 0x3e3   : > { %v1927_v26 = vpop.eup %1926 }
 0x3e4   : > { %v894_v23 = vpop.permute.xlu0 %893  ;;  %v1010_v28 = vmul.f32 %v1927_v26, %v1919_v7 }
 0x3e5   : > { %v899_v24 = vsel %vm783_vm3, %v894_v23, 0 }
 0x3e6   : > { %1749 = vmatpush3.bf16.msra.mxu1 %v899_v24  ;;  %v1011_v30 = vpack.c.bf16 %v1010_v28, %v1010_v28 }
 0x3e7   : > { %1760 = vmatprep.subr.bf16.mxu1 %v2095_v0 }
 0x3e9   : > { %1751 = vmatmul.mubr.msk.bf16.vlgmr.msra.gmra.mrb[16].mxu1 %vm718_vm2, %v892_v20  ;;  %v1653_v20 = vld [vmem:[%s2579_s12] ss:$0 sm:$0xff] }
 0x3ea   : > { %1761 = vmatpush3.bf16.msra.mxu1 %v1018_v27  ;;  %1762 = vmatprep.mubr.msk.bf16.mxu1 %vm2096_vm0, %v2095_v0  ;;  %v1654_v27 = vld [vmem:[%s2580_s13] ss:$0 sm:$0xff] }
 0x3eb   : > { %1772 = vmatprep.subr.bf16.mxu1 %v2095_v0  ;;  %v1929_v31 = vpop.eup %1928 }
 0x3ec   : > { %v1129_v33 = vmul.f32 %v1929_v31, %v1921_v9  ;;  %v1904_v9 = vld [vmem:[#allocation8] sm:$0xff]   ;;  %v1912_v31 = vld [vmem:[%s2577_s10 + $0x30] sm:$0xff]  }
 0x3ee   : > { %v1130_v34 = vpack.c.bf16 %v1129_v33, %v1129_v33  ;;  %v1655_v33 = vld [vmem:[%s2576_s9] ss:$0 sm:$0xff] }
 0x3f1   : > { %1763 = vmatmul.mubr.msk.bf16.vlgmr.msra.gmra.mrb[20].mxu1 %vm718_vm2, %v1011_v30 }
 0x3f2   : > { %1773 = vmatpush3.bf16.msra.mxu1 %v1137_v32  ;;  %1774 = vmatprep.mubr.msk.bf16.mxu1 %vm2096_vm0, %v2095_v0  ;;  %v1913_v32 = vld [vmem:[%s2577_s10 + $0x38] sm:$0xff]  }
 0x3f3   : > { %1786 = vmatprep.subr.bf16.mxu1 %v2095_v0 }
 0x3f9   : > { %1775 = vmatmul.mubr.msk.bf16.vlgmr.msra.gmra.mrb[24].mxu1 %vm718_vm2, %v1130_v34 }
 0x3fa   : > { %1790 = vmatprep.mubr.msk.bf16.mxu1 %vm2096_vm0, %v2095_v0  ;;  %1787 = vmatpush3.bf16.msra.mxu1 %v1904_v9 }
 0x3fb   : > { %1788 = vmatprep.subr.bf16.mxu1 %v2095_v0 }
 0x3fe   : > { %1789 = vmatpush3.bf16.msra.mxu1 %v1905_v10 }
 0x441   : > { %v821_v35 = vpop.f32.mrb[12].mxu1 }
 0x442   : > { %v827_v36 = vpack.c.bf16 %v821_v35, %v821_v35  ;;  %v1740_v37 = vpop.f32.mrb[13].mxu1 }
 0x443   : > { %v824_v38 = vpop.f32.mrb[14].mxu1 }
 0x444   : > { %829 = vst.msk [vmem:[#allocation2] sm:$0xf] %vm828_vm4, %v827_v36  ;;  %v1741_v39 = vpop.f32.mrb[15].mxu1 }
 0x4bc   : > { %v935_v40 = vpop.f32.mrb[16].mxu1 }
 0x4bd   : > { %v1674_v41 = vpack.c.bf16 %v935_v40, %v935_v40  ;;  %v1752_v42 = vpop.f32.mrb[17].mxu1 }
 0x4be   : > { %v938_v43 = vpop.f32.mrb[18].mxu1 }
 0x4bf   : > { %945 = vrot.lane.b32.xlu0 %v1674_v41, %s2104_s22  ;;  %v1753_v44 = vpop.f32.mrb[19].mxu1  ;;  %s2024_s22 = scalar_lea.vmem %s2023_s27, 256 }
 0x4c0   : > { %p2026_p1 = scmp.lt.s32.totalorder %s2024_s22, %s2018_s15 }
 0x4c2   : > { %p2027_p6 = por %p2026_p1, %p2025_p13 }
 0x4c4   : > { %v1054_v46 = vpop.f32.mrb[20].mxu1  ;;  %p2028_p9 = pnand %p2027_p6, %p2021_p11 }
 0x4c5   : > { %v1675_v48 = vpack.c.bf16 %v1054_v46, %v1054_v46  ;;  %v1764_v49 = vpop.f32.mrb[21].mxu1 }
 0x4c6   : > { %v1057_v50 = vpop.f32.mrb[22].mxu1 }
 0x4c7   : > { %1064 = vrot.lane.b32.xlu1 %v1675_v48, %s2105_s0  ;;  %v1765_v51 = vpop.f32.mrb[23].mxu1  ;;  %s2622_s0 = sld [smem:[#allocation22_spill]] }
 0x4cc   : > { %v1173_v52 = vpop.f32.mrb[24].mxu1 }
 0x4cd   : > { %v1676_v53 = vpack.c.bf16 %v1173_v52, %v1173_v52  ;;  %v1776_v54 = vpop.f32.mrb[25].mxu1 }
 0x4ce   : > { %v1176_v55 = vpop.f32.mrb[26].mxu1 }
 0x4cf   : > { %1183 = vrot.lane.b32.xlu0 %v1676_v53, %s2106_s17  ;;  %v1777_v56 = vpop.f32.mrb[27].mxu1 }
 0x531   : > { %v946_v57 = vpop.permute.xlu0 %945 }
 0x532   : > { %949 = vst.msk [vmem:[#allocation2] sm:$0xf] %vm948_vm5, %v946_v57 }
 0x539   : > { %v1065_v58 = vpop.permute.xlu1 %1064 }
 0x53a   : > { %1068 = vst.msk [vmem:[#allocation2] sm:$0xf] %vm1067_vm6, %v1065_v58 }
 0x541   : > { %v1184_v59 = vpop.permute.xlu0 %1183 }
 0x542   : > { %1187 = vst.msk [vmem:[#allocation2] sm:$0xf] %vm1186_vm7, %v1184_v59  ;;  %v1668_v59 = vld [vmem:[%s2622_s0] ss:$0 sm:$0xff] }
 0x549   : > { %v1188_v60 = vld [vmem:[#allocation2] sm:$0xf] }
 0x54a   : > { %1783 = vmatmul.mubr.msk.bf16.vlgmr.msra.gmra.mrb[12].mxu0 %vm606_vm1, %v1188_v60 }
 0x54b   : > { %1810 = vmatprep.mubr.msk.bf16.mxu0 %vm2096_vm0, %v2095_v0 }
 0x61d   : > { %v1249_v62 = vpop.f32.mrb[12].mxu0 }
 0x61e   : > { %v1250_v63 = vadd.f32 %v1649_v61, %v1249_v62  ;;  %v1784_v1 = vpop.f32.mrb[13].mxu0  ;;  %v1669_v61 = vld [vmem:[%s2623_s28] ss:$0 sm:$0xff] }
 0x61f   : > { %v1252_v2 = vpop.f32.mrb[14].mxu0 }
 0x620   : > { %v2457_v4 = vadd.f32 %v1250_v63, %v2367_v3  ;;  %v1785_v5 = vpop.f32.mrb[15].mxu0  ;;  %v1906_v3 = vld [vmem:[%s2577_s10] sm:$0xff]  }
 0x621   : > { %1795 = vmatpush3.bf16.msra.mxu0 %v1906_v3 }
 0x622   : > { %v1259_v6 = vsel %vm606_vm1, %v2457_v4, 0.0  ;;  %v1263_v7 = vmul.f32 %v2457_v4, %v2457_v4  ;;  %1796 = vmatprep.subr.bf16.mxu0 %v2095_v0 }
 0x623   : > { %1260 = vadd.xlane.f32.xlu1 %v1259_v6 }
 0x624   : > { %v1264_v8 = vsel %vm606_vm1, %v1263_v7, 0.0 }
 0x625   : > { %1265 = vadd.xlane.f32.xlu0 %v1264_v8  ;;  %1797 = vmatpush3.bf16.msra.mxu0 %v1907_v11 }
 0x626   : > { %1798 = vmatprep.subr.bf16.mxu0 %v2095_v0 }
 0x629   : > { %1799 = vmatpush3.bf16.msra.mxu0 %v1908_v12 }
 0x62a   : > { %1800 = vmatprep.subr.bf16.mxu0 %v2095_v0 }
 0x62d   : > { %1801 = vmatpush3.bf16.msra.mxu0 %v1909_v13 }
 0x62e   : > { %1802 = vmatprep.subr.bf16.mxu0 %v2095_v0 }
 0x631   : > { %1803 = vmatpush3.bf16.msra.mxu0 %v1910_v14 }
 0x632   : > { %1804 = vmatprep.subr.bf16.mxu0 %v2095_v0 }
 0x635   : > { %1805 = vmatpush3.bf16.msra.mxu0 %v1911_v15 }
 0x636   : > { %1806 = vmatprep.subr.bf16.mxu0 %v2095_v0 }
 0x639   : > { %1807 = vmatpush3.bf16.msra.mxu0 %v1912_v31 }
 0x63a   : > { %1808 = vmatprep.subr.bf16.mxu0 %v2095_v0  ;;  %v1659_v0 = vld [vmem:[%s2578_s11] ss:$0 sm:$0xff] }
 0x63d   : > { %1809 = vmatpush3.bf16.msra.mxu0 %v1913_v32 }
 0x6b0   : > { %v1261_v16 = vpop.xlane.xlu1 %1260 }
 0x6b1   : > { %v1262_v17 = vmul.f32 0.03125, %v1261_v16 }
 0x6b2   : > { %v1266_v18 = vpop.xlane.xlu0 %1265 }
 0x6b3   : > { %v1268_v19 = vmul.f32 %v1262_v17, %v1262_v17  ;;  %v1267_v21 = vmul.f32 0.03125, %v1266_v18  ;;  %v1270_v24 = vsub.f32 %v2457_v4, %v1262_v17 }
 0x6b5   : > { %v1269_v22 = vsub.f32 %v1267_v21, %v1268_v19 }
 0x6b7   : > { %v1271_v23 = vadd.f32 1e-05, %v1269_v22 }
 0x6b9   : > { %1930 = vrsqrt.f32 %v1271_v23 }
 0x6c3   : > { %v1931_v25 = vpop.eup %1930 }
 0x6c4   : > { %v1273_v26 = vmul.f32 %v1931_v25, %v1270_v24 }
 0x6c6   : > { %v1280_v28 = vmul.f32 %v1653_v20, %v1273_v26 }
 0x6c8   : > { %v1287_v29 = vadd.f32 %v1654_v27, %v1280_v28 }
 0x6ca   : > { %v1288_v30 = vpack.c.bf16 %v1287_v29, %v1287_v29 }
 0x6cc   : > { %1791 = vmatmul.mubr.msk.bf16.vlgmr.msra.gmra.mrb[28].mxu1 %vm606_vm1, %v1288_v30 }
 0x79f   : > { %v1349_v34 = vpop.f32.mrb[28].mxu1 }
 0x7a0   : > { %v1350_v35 = vadd.f32 %v1655_v33, %v1349_v34  ;;  %v1792_v36 = vpop.f32.mrb[29].mxu1 }
 0x7a1   : > { %v1352_v37 = vpop.f32.mrb[30].mxu1 }
 0x7a2   : > { %v1355_v38 = vmax.f32 %v1350_v35, 0.0  ;;  %v1793_v39 = vpop.f32.mrb[31].mxu1 }
 0x7a4   : > { %v1356_v40 = vpack.c.bf16 %v1355_v38, %v1355_v38 }
 0x7a6   : > { %1811 = vmatmul.mubr.bf16.vlgmr.msra.gmra.mrb[16].mxu0 %v1356_v40 }
 0x879   : > { %v1462_v41 = vpop.f32.mrb[16].mxu0 }
 0x87a   : > { %v1463_v42 = vadd.f32 %v1659_v0, %v1462_v41  ;;  %v1812_v43 = vpop.f32.mrb[17].mxu0 }
 0x87b   : > { %v1465_v44 = vpop.f32.mrb[18].mxu0 }
 0x87c   : > { %v1468_v45 = vadd.f32 %v1463_v42, %v2457_v4  ;;  %v1813_v46 = vpop.f32.mrb[19].mxu0 }
 0x87e   : > { %v1471_v47 = vsel %vm606_vm1, %v1468_v45, 0.0  ;;  %v1475_v48 = vmul.f32 %v1468_v45, %v1468_v45 }
 0x87f   : > { %1472 = vadd.xlane.f32.xlu0 %v1471_v47 }
 0x880   : > { %v1476_v49 = vsel %vm606_vm1, %v1475_v48, 0.0 }
 0x881   : > { %1477 = vadd.xlane.f32.xlu1 %v1476_v49 }
 0x90c   : > { %v1473_v50 = vpop.xlane.xlu0 %1472 }
 0x90d   : > { %v1474_v51 = vmul.f32 0.03125, %v1473_v50 }
 0x90e   : > { %v1478_v52 = vpop.xlane.xlu1 %1477 }
 0x90f   : > { %v1480_v53 = vmul.f32 %v1474_v51, %v1474_v51  ;;  %v1479_v54 = vmul.f32 0.03125, %v1478_v52  ;;  %v1482_v57 = vsub.f32 %v1468_v45, %v1474_v51 }
 0x911   : > { %v1481_v55 = vsub.f32 %v1479_v54, %v1480_v53 }
 0x913   : > { %v1483_v56 = vadd.f32 1e-05, %v1481_v55 }
 0x915   : > { %1932 = vrsqrt.f32 %v1483_v56 }
 0x91f   : > { %v1933_v58 = vpop.eup %1932 }
 0x920   : > { %v1485_v60 = vmul.f32 %v1933_v58, %v1482_v57 }
 0x922   : > { %v1492_v62 = vmul.f32 %v1668_v59, %v1485_v60 }
 0x924   : > { %v1499_v63 = vadd.f32 %v1669_v61, %v1492_v62 }
 0x926   : > { %1500 = vst.msk [vmem:[%s569_s24] sm:$0xff] %vm606_vm1, %v1499_v63 }
 0x927   : > { %2031 = shalt.err (!%p2028_p9)
}
 0x928   : > { %s2032_s26 = scalar_lea.hbm %s2524_s23, 128  ;;  %s2036_s19 = scalar_lea.hbm %s2624_s16, 512 }
 0x929   : > { %p2033_p2 = scmp.ne.s32.totalorder %s2524_s23, %s2032_s26  ;;  %p2037_p5 = scmp.lt.u32.totalorder %s2524_s23, %s2624_s16 }
 0x92a   : > { %p2038_p10 = scmp.lt.u32.totalorder %s2036_s19, %s2032_s26  ;;  %p2040_p12 = scmp.lt.u32.totalorder %s2032_s26, %s2524_s23 }
 0x92b   : > { %p2034_p0 = pnand %p2033_p2, %p2625_p7 }
 0x92c   : > { %p2039_p4 = por %p2038_p10, %p2037_p5 }
 0x92d   : > { %p2035_p3 = pneg %p2034_p0 }
 0x92e   : > { %p2041_p8 = por %p2040_p12, %p2039_p4 }
 0x930   : > { %p2042_p11 = pnand %p2041_p8, %p2035_p3 }
 0x932   : > { %2045 = shalt.err (!%p2042_p11)
}
 0x933   : > { %1826 = dma.vmem_to_hbm [thread:$0]  (%p2625_p7), %s2526_s20, 128, %s2524_s23, %s1502_s18  }
 0x934 PF: > { %s2626_s24 = sld [smem:[#allocation16_spill]]  ;;  %s2627_s29 = sld [smem:[#allocation13_spill]] }
 0x935   : > { %s2628_s14 = sld [smem:[#allocation20_spill]] }
 0x93a   : > { %p1848_p13 = scmp.ge.s32.totalorder %s2626_s24, 2  ;;  %s1527_s15 = sand.u32 1, %s2627_s29  }
 0x93b   : > { %p2629_p1 = scmp.ne.s32.totalorder %s2628_s14, 0  ;;  %s1528_s25 = scalar_lea.sflag [#allocation5], %s1527_s15 }
 0x93d   : > { %p1839_p6 = pnand %p1848_p13, %p2629_p1 }
 0x93f   : > { %2071 = dma.done.wait (!%p1839_p6), %s1528_s25, 128  }
 0x940   : > { %2073 = vsyncadd (!%p1839_p6), %s1528_s25, 4294967168  ;;  %s2630_s24 = sld [smem:[#allocation17_spill]]  ;;  %s2631_s21 = sld [smem:[#allocation14_spill]] }
 0x941   : > { %s2632_s22 = sld [smem:[#allocation15_spill]]  ;;  %s2633_s23 = sld [smem:[#allocation18_spill]] }
 0x946   : > { %p28_p9 = scmp.ge.s32.totalorder %s2630_s24, 6  }
 0x948   :  { %30 = sbr.rel (!%p28_p9) target bundleno = 10 (0xa), region = 135 }
 0x94f   :  { %1533 = vsyncpa [#allocation4], 1 }
 0x950   :  { %1535 = vsyncpa [#allocation4 + $0x1], 1 }
 0x951   :  { %1536 = vsyncpa [#allocation7], 1 }
 0x952   :  { %1537 = vsyncpa [#allocation5], 1 }
 0x953   :  { %1539 = vsyncpa [#allocation5 + $0x1], 1 }

</bundles_post_ra>
